<compile_context>
chip_gen: v6e
topology: v6e:2x2x1
jax: 0.10.0
libtpu: 0.0.40
codegen_flags: <defaults>
</compile_context>

<pallas_src>
import functools
import math

import jax
import jax.numpy as jnp
from jax.experimental import pallas as pl
from jax.experimental.pallas import tpu as pltpu


# ----------------------------- fused Pallas kernel -----------------------------

def _fused_upsample_kernel(x_ref, w_ref, b_ref, o_ref, *, W):
    """conv1x1 + ReLU + pixel_shuffle(2) + ReplicationPad2d((1,0,1,0)) + AvgPool2d(2, stride=1).

    Single grid step; the whole (tiny) problem lives in VMEM.
      x_ref: (B, Cin, H*W)    input, spatial flattened row-major (lane-dense)
      w_ref: (4*nf, Cin)      conv weights, phase-major rows (row = p*nf + c, p = di*2 + dj)
      b_ref: (4*nf, 1)        conv bias, phase-major
      o_ref: (4, nf, B*H*W)   blurred output, phase (low-res) domain, batch folded into lanes
    """
    B = x_ref.shape[0]
    HW = x_ref.shape[2]
    nf = o_ref.shape[1]

    # Fold batch into lanes (lane-aligned concat, HW % 128 == 0) -> one matmul for everything.
    x = jnp.concatenate([x_ref[b] for b in range(B)], axis=-1)          # (Cin, B*HW)

    # 1x1 conv for all 4 pixel-shuffle phases and all batches in ONE MXU matmul,
    # then a single bias broadcast-add and a single ReLU at full 16-row width.
    y = jnp.dot(w_ref[...], x, preferred_element_type=jnp.float32)      # (4*nf, B*HW)
    y = jnp.maximum(y + b_ref[...], 0.0)

    # ReplicationPad(top/left 1) + 2x2 mean, evaluated directly in the phase (low-res) domain.
    # Lane l = b*HW + i*W + j, so "(i-1, j)" is a lane roll by W and "(i, j-1)" a roll by 1.
    # Wrap-around lanes (including batch-boundary wraps) are exactly the lanes replaced by the
    # replication-pad edge masks below, so the rolls stay correct with batch folded into lanes.
    bhw = y.shape[1]
    lane = jax.lax.broadcasted_iota(jnp.int32, (nf, bhw), 1)
    first_row = (lane % HW) < W           # low-res i == 0 (top edge of each image)
    first_col = (lane % W) == 0           # low-res j == 0 (left edge)

    yu = pltpu.roll(y, shift=W, axis=1)   # value at (i-1, j) for every conv row (full width)
    yl = pltpu.roll(y, shift=1, axis=1)   # value at (i, j-1) for every conv row (full width)

    # Phase slices (p = di*2 + dj), taken only for the final weighted sums.
    p00, p01 = y[0 * nf:1 * nf], y[1 * nf:2 * nf]
    p10, p11 = y[2 * nf:3 * nf], y[3 * nf:4 * nf]
    up10, up11 = yu[2 * nf:3 * nf], yu[3 * nf:4 * nf]
    lp01, lp11 = yl[1 * nf:2 * nf], yl[3 * nf:4 * nf]
    lup11 = pltpu.roll(up11, shift=1, axis=1)                 # value at (i-1, j-1) of phase (1,1)

    u0 = jnp.where(first_row, p00, up10)                      # a(2i-1, 2j)   (clamped)
    u1 = jnp.where(first_row, p01, up11)                      # a(2i-1, 2j+1) (clamped)
    l00 = jnp.where(first_col, p00, lp01)                     # a(2i,   2j-1) (clamped)
    l10 = jnp.where(first_col, p10, lp11)                     # a(2i+1, 2j-1) (clamped)
    ul00 = jnp.where(first_col, u0,
                     jnp.where(first_row, lp01, lup11))       # a(2i-1, 2j-1) (clamped)

    # Full-lane (nf, B*HW) stores, leading-int indexing only.
    o_ref[0] = ((p00 + u0 + l00 + ul00) * 0.25).astype(o_ref.dtype)   # out phase (0, 0)
    o_ref[1] = ((p01 + u1 + p00 + u0) * 0.25).astype(o_ref.dtype)     # out phase (0, 1)
    o_ref[2] = ((p10 + p00 + l10 + l00) * 0.25).astype(o_ref.dtype)   # out phase (1, 0)
    o_ref[3] = ((p11 + p01 + p10 + p00) * 0.25).astype(o_ref.dtype)   # out phase (1, 1)


# ----------------------------- wrapper -----------------------------------------

def pixel_shuffle_icnr_forward(x, weight, bias, *, scale=2):
    """x: (B, Cin, H, W) NCHW; weight: (nf*scale^2, Cin, 1, 1); bias: (nf*scale^2,)."""
    assert scale == 2, "kernel is specialized for scale=2 (the value MyUp uses)"
    B, Cin, H, W = x.shape
    Cout = weight.shape[0]
    r2 = scale * scale
    nf = Cout // r2
    HW = H * W

    # Phase-major re-pack of the 1x1 conv params (p = di*2 + dj).  Weight-only; folded under jit.
    w2 = weight[:, :, 0, 0]                                               # (Cout, Cin)
    w_phase = w2.reshape(nf, r2, Cin).transpose(1, 0, 2).reshape(Cout, Cin)
    b_phase = bias.reshape(nf, r2).transpose(1, 0).reshape(Cout, 1)

    x2 = x.reshape(B, Cin, HW)   # free reshape (merges the two minor dims only)

    # Advisory cost estimate so XLA can overlap this tiny custom call with neighbouring ops.
    flops = 2 * Cout * Cin * B * HW + 24 * nf * B * HW
    bytes_accessed = 4 * (x2.size + w_phase.size + b_phase.size + r2 * nf * B * HW)

    y_phase = pl.pallas_call(
        functools.partial(_fused_upsample_kernel, W=W),
        out_shape=jax.ShapeDtypeStruct((r2, nf, B * HW), x.dtype),
        cost_estimate=pl.CostEstimate(flops=flops, transcendentals=0,
                                      bytes_accessed=bytes_accessed),
    )(x2, w_phase, b_phase)

    # Final phase -> NCHW interleave (~32 KB/batch of pure data movement): one small XLA transpose.
    # TODO(synk): the pixel-shuffle interleave is a doubly-strided lane/sublane scatter; there is
    #             no robust Mosaic store pattern for it at f32, so it stays as one fused XLA op.
    y = y_phase.reshape(scale, scale, nf, B, H, W)           # [di, dj, c, b, i, j]
    y = jnp.transpose(y, (3, 2, 4, 0, 5, 1))                 # [b, c, i, di, j, dj]
    return y.reshape(B, nf, H * scale, W * scale)


def myup_up_pad_concat(x1, x2, weight, bias, *, scale=2):
    """MyUp.forward front half: up(x1) -> F.pad to x2's spatial size -> cat([x2, x1], dim=1)."""
    up = pixel_shuffle_icnr_forward(x1, weight, bias, scale=scale)
    dy = x2.shape[2] - up.shape[2]
    dx = x2.shape[3] - up.shape[3]
    up = jnp.pad(up, ((0, 0), (0, 0), (dy // 2, dy - dy // 2), (dx // 2, dx - dx // 2)))
    # TODO(synk): MyUp's ProjectionLayer / ResidualBlock conv stack is not defined in the spec,
    #             so the double-conv tail is omitted here.
    return jnp.concatenate([x2, up], axis=1)


# ----------------------------- parameter init ----------------------------------

def icnr_weight(key, out_ch, in_ch, h=1, w=1, scale=2):
    """Mirrors icnr() tensor ops with a deterministic kaiming-normal-style init."""
    ni2 = out_ch // (scale ** 2)
    fan_in = in_ch * h * w
    std = math.sqrt(2.0 / fan_in)                    # kaiming_normal_ (fan_in, relu gain)
    k = std * jax.random.normal(key, (ni2, in_ch, h, w), dtype=jnp.float32)
    k = jnp.transpose(k, (1, 0, 2, 3))               # .transpose(0, 1)
    k = k.reshape(ni2, in_ch, h * w)                 # .view(ni2, nf, -1)
    k = jnp.tile(k, (1, 1, scale ** 2))              # .repeat(1, 1, scale**2)
    k = k.reshape(in_ch, out_ch, h, w)               # .view([nf, ni, h, w])
    return jnp.transpose(k, (1, 0, 2, 3))            # .transpose(0, 1) -> (out, in, h, w)


# ----------------------------- reference (pure JAX) ------------------------------

def _pixel_shuffle_ref(x, r):
    B, C, H, W = x.shape
    nf = C // (r * r)
    x = x.reshape(B, nf, r, r, H, W)
    x = jnp.transpose(x, (0, 1, 4, 2, 5, 3))
    return x.reshape(B, nf, H * r, W * r)


def _reference(x, weight, bias, scale):
    w = weight[:, :, 0, 0]
    y = jnp.einsum('oc,bchw->bohw', w, x,
                   precision=jax.lax.Precision.HIGHEST) + bias[None, :, None, None]
    y = jnp.maximum(y, 0.0)
    y = _pixel_shuffle_ref(y, scale)
    y = jnp.pad(y, ((0, 0), (0, 0), (1, 0), (1, 0)), mode='edge')
    return 0.25 * (y[:, :, :-1, :-1] + y[:, :, :-1, 1:]
                   + y[:, :, 1:, :-1] + y[:, :, 1:, 1:])


# ----------------------------- main ----------------------------------------------

if __name__ == "__main__":
    ni, nf, scale = 8, 4, 2
    B, H, W = 2, 16, 16
    cout = nf * scale ** 2

    key = jax.random.PRNGKey(0)
    kx, kw, kb, k2 = jax.random.split(key, 4)

    x1 = jax.random.normal(kx, (B, ni, H, W), dtype=jnp.float32)
    weight = icnr_weight(kw, cout, ni, 1, 1, scale=2)          # icnr default scale=2
    bound = 1.0 / math.sqrt(ni * 1 * 1)
    bias = jax.random.uniform(kb, (cout,), dtype=jnp.float32,
                              minval=-bound, maxval=bound)

    fwd = jax.jit(pixel_shuffle_icnr_forward, static_argnames=("scale",))
    out = jax.block_until_ready(fwd(x1, weight, bias, scale=scale))
    ref = jax.block_until_ready(_reference(x1, weight, bias, scale))

    assert out.shape == (B, nf, H * scale, W * scale), out.shape
    assert jnp.allclose(out, ref, atol=1e-5, rtol=1e-5), float(jnp.max(jnp.abs(out - ref)))

    # Exercise the MyUp front-half glue (up -> pad -> concat with the skip tensor x2).
    x2 = jax.random.normal(k2, (B, ni, H * scale, W * scale), dtype=jnp.float32)
    front = jax.jit(myup_up_pad_concat, static_argnames=("scale",))
    cat = jax.block_until_ready(front(x1, x2, weight, bias, scale=scale))
    assert cat.shape == (B, ni + nf, H * scale, W * scale), cat.shape

    print("KERNEL_OK")
</pallas_src>

<mosaic_0001>
module attributes {stable_mosaic.version = 11 : i64} {
  func.func @_fused_upsample_kernel(%arg0: memref<2x8x256xf32, #tpu.memory_space<vmem>>, %arg1: memref<16x8xf32, #tpu.memory_space<vmem>>, %arg2: memref<16x1xf32, #tpu.memory_space<vmem>>, %arg3: memref<4x4x512xf32, #tpu.memory_space<vmem>>) attributes {dimension_semantics = [], scalar_prefetch = 0 : i64, scratch_operands = 0 : i64, tpu.core_type = #tpu.core_type<tc>} {
    %c0 = arith.constant 0 : index
    %c0_0 = arith.constant 0 : index
    %c0_1 = arith.constant 0 : index
    %0 = vector.load %arg0[%c0, %c0_0, %c0_1] : memref<2x8x256xf32, #tpu.memory_space<vmem>>, vector<1x8x256xf32>
    %1 = vector.shape_cast %0 : vector<1x8x256xf32> to vector<8x256xf32>
    %c1 = arith.constant 1 : index
    %c0_2 = arith.constant 0 : index
    %c0_3 = arith.constant 0 : index
    %2 = vector.load %arg0[%c1, %c0_2, %c0_3] : memref<2x8x256xf32, #tpu.memory_space<vmem>>, vector<1x8x256xf32>
    %3 = vector.shape_cast %2 : vector<1x8x256xf32> to vector<8x256xf32>
    %4 = tpu.concatenate %1, %3 in 1 : vector<8x256xf32>, vector<8x256xf32> -> vector<8x512xf32>
    %c0_4 = arith.constant 0 : index
    %c0_5 = arith.constant 0 : index
    %5 = vector.load %arg1[%c0_4, %c0_5] : memref<16x8xf32, #tpu.memory_space<vmem>>, vector<16x8xf32>
    %cst = arith.constant dense<0.000000e+00> : vector<16x512xf32>
    %6 = tpu.matmul %5, %4, %cst {dimension_numbers = #tpu.dot_dimension_numbers<[1], [0], [0], [1], [0, 0, 1, 1], [], []>} : vector<16x8xf32>, vector<8x512xf32>, vector<16x512xf32> -> vector<16x512xf32>
    %c0_6 = arith.constant 0 : index
    %c0_7 = arith.constant 0 : index
    %7 = vector.load %arg2[%c0_6, %c0_7] : memref<16x1xf32, #tpu.memory_space<vmem>>, vector<16x1xf32>
    %8 = vector.broadcast %7 : vector<16x1xf32> to vector<16x512xf32>
    %9 = arith.addf %6, %8 : vector<16x512xf32>
    %cst_8 = arith.constant 0.000000e+00 : f32
    %10 = vector.broadcast %cst_8 : f32 to vector<16x512xf32>
    %11 = arith.maximumf %9, %10 : vector<16x512xf32>
    %12 = tpu.iota {dimensions = array<i32: 1>} : vector<4x512xi32>
    %c256_i32 = arith.constant 256 : i32
    %c0_i32 = arith.constant 0 : i32
    %13 = arith.cmpi eq, %c256_i32, %c0_i32 : i32
    %c1_i32 = arith.constant 1 : i32
    %14 = arith.select %13, %c1_i32, %c256_i32 : i32
    %15 = vector.broadcast %14 : i32 to vector<4x512xi32>
    %16 = arith.remsi %12, %15 : vector<4x512xi32>
    %c0_i32_9 = arith.constant 0 : i32
    %17 = vector.broadcast %c0_i32_9 : i32 to vector<4x512xi32>
    %18 = arith.cmpi ne, %16, %17 : vector<4x512xi32>
    %c0_i32_10 = arith.constant 0 : i32
    %19 = vector.broadcast %c0_i32_10 : i32 to vector<4x512xi32>
    %20 = arith.cmpi slt, %16, %19 : vector<4x512xi32>
    %c0_i32_11 = arith.constant 0 : i32
    %21 = arith.cmpi slt, %14, %c0_i32_11 : i32
    %22 = vector.broadcast %21 : i1 to vector<4x512xi1>
    %23 = vector.broadcast %22 : vector<4x512xi1> to vector<4x512xi1>
    %24 = arith.xori %20, %23 : vector<4x512xi1>
    %25 = arith.andi %24, %18 : vector<4x512xi1>
    %26 = vector.broadcast %14 : i32 to vector<4x512xi32>
    %27 = arith.addi %16, %26 : vector<4x512xi32>
    %28 = arith.select %25, %27, %16 : vector<4x512xi1>, vector<4x512xi32>
    %c16_i32 = arith.constant 16 : i32
    %29 = vector.broadcast %c16_i32 : i32 to vector<4x512xi32>
    %30 = arith.cmpi slt, %28, %29 : vector<4x512xi32>
    %c16_i32_12 = arith.constant 16 : i32
    %c0_i32_13 = arith.constant 0 : i32
    %31 = arith.cmpi eq, %c16_i32_12, %c0_i32_13 : i32
    %c1_i32_14 = arith.constant 1 : i32
    %32 = arith.select %31, %c1_i32_14, %c16_i32_12 : i32
    %33 = vector.broadcast %32 : i32 to vector<4x512xi32>
    %34 = arith.remsi %12, %33 : vector<4x512xi32>
    %c0_i32_15 = arith.constant 0 : i32
    %35 = vector.broadcast %c0_i32_15 : i32 to vector<4x512xi32>
    %36 = arith.cmpi ne, %34, %35 : vector<4x512xi32>
    %c0_i32_16 = arith.constant 0 : i32
    %37 = vector.broadcast %c0_i32_16 : i32 to vector<4x512xi32>
    %38 = arith.cmpi slt, %34, %37 : vector<4x512xi32>
    %c0_i32_17 = arith.constant 0 : i32
    %39 = arith.cmpi slt, %32, %c0_i32_17 : i32
    %40 = vector.broadcast %39 : i1 to vector<4x512xi1>
    %41 = vector.broadcast %40 : vector<4x512xi1> to vector<4x512xi1>
    %42 = arith.xori %38, %41 : vector<4x512xi1>
    %43 = arith.andi %42, %36 : vector<4x512xi1>
    %44 = vector.broadcast %32 : i32 to vector<4x512xi32>
    %45 = arith.addi %34, %44 : vector<4x512xi32>
    %46 = arith.select %43, %45, %34 : vector<4x512xi1>, vector<4x512xi32>
    %c0_i32_18 = arith.constant 0 : i32
    %47 = vector.broadcast %c0_i32_18 : i32 to vector<4x512xi32>
    %48 = arith.cmpi eq, %46, %47 : vector<4x512xi32>
    %c16_i32_19 = arith.constant 16 : i32
    %49 = tpu.dynamic_rotate %11 by %c16_i32_19 dim 1 : vector<16x512xf32>, i32 -> vector<16x512xf32>
    %c1_i32_20 = arith.constant 1 : i32
    %50 = tpu.dynamic_rotate %11 by %c1_i32_20 dim 1 : vector<16x512xf32>, i32 -> vector<16x512xf32>
    %51 = vector.extract_strided_slice %11 {offsets = [0, 0], sizes = [4, 512], strides = [1, 1]} : vector<16x512xf32> to vector<4x512xf32>
    %52 = vector.extract_strided_slice %11 {offsets = [4, 0], sizes = [4, 512], strides = [1, 1]} : vector<16x512xf32> to vector<4x512xf32>
    %53 = vector.extract_strided_slice %11 {offsets = [8, 0], sizes = [4, 512], strides = [1, 1]} : vector<16x512xf32> to vector<4x512xf32>
    %54 = vector.extract_strided_slice %11 {offsets = [12, 0], sizes = [4, 512], strides = [1, 1]} : vector<16x512xf32> to vector<4x512xf32>
    %55 = vector.extract_strided_slice %49 {offsets = [8, 0], sizes = [4, 512], strides = [1, 1]} : vector<16x512xf32> to vector<4x512xf32>
    %56 = vector.extract_strided_slice %49 {offsets = [12, 0], sizes = [4, 512], strides = [1, 1]} : vector<16x512xf32> to vector<4x512xf32>
    %57 = vector.extract_strided_slice %50 {offsets = [4, 0], sizes = [4, 512], strides = [1, 1]} : vector<16x512xf32> to vector<4x512xf32>
    %58 = vector.extract_strided_slice %50 {offsets = [12, 0], sizes = [4, 512], strides = [1, 1]} : vector<16x512xf32> to vector<4x512xf32>
    %c1_i32_21 = arith.constant 1 : i32
    %59 = tpu.dynamic_rotate %56 by %c1_i32_21 dim 1 : vector<4x512xf32>, i32 -> vector<4x512xf32>
    %60 = arith.select %30, %51, %55 : vector<4x512xi1>, vector<4x512xf32>
    %61 = arith.select %30, %52, %56 : vector<4x512xi1>, vector<4x512xf32>
    %62 = arith.select %48, %51, %57 : vector<4x512xi1>, vector<4x512xf32>
    %63 = arith.select %48, %53, %58 : vector<4x512xi1>, vector<4x512xf32>
    %64 = arith.select %30, %57, %59 : vector<4x512xi1>, vector<4x512xf32>
    %65 = arith.select %48, %60, %64 : vector<4x512xi1>, vector<4x512xf32>
    %66 = arith.addf %51, %60 : vector<4x512xf32>
    %67 = arith.addf %66, %62 : vector<4x512xf32>
    %68 = arith.addf %67, %65 : vector<4x512xf32>
    %cst_22 = arith.constant 2.500000e-01 : f32
    %69 = vector.broadcast %cst_22 : f32 to vector<4x512xf32>
    %70 = arith.mulf %68, %69 : vector<4x512xf32>
    %c0_23 = arith.constant 0 : index
    %c0_24 = arith.constant 0 : index
    %c0_25 = arith.constant 0 : index
    %71 = vector.load %arg3[%c0_23, %c0_24, %c0_25] : memref<4x4x512xf32, #tpu.memory_space<vmem>>, vector<1x4x512xf32>
    %72 = vector.shape_cast %71 : vector<1x4x512xf32> to vector<4x512xf32>
    %73 = vector.shape_cast %70 : vector<4x512xf32> to vector<1x4x512xf32>
    tpu.vector_store %arg3[%c0_23, %c0_24, %c0_25], %73 {strides = array<i32>} : memref<4x4x512xf32, #tpu.memory_space<vmem>>, vector<1x4x512xf32>,
    %74 = arith.addf %52, %61 : vector<4x512xf32>
    %75 = arith.addf %74, %51 : vector<4x512xf32>
    %76 = arith.addf %75, %60 : vector<4x512xf32>
    %cst_26 = arith.constant 2.500000e-01 : f32
    %77 = vector.broadcast %cst_26 : f32 to vector<4x512xf32>
    %78 = arith.mulf %76, %77 : vector<4x512xf32>
    %c1_27 = arith.constant 1 : index
    %c0_28 = arith.constant 0 : index
    %c0_29 = arith.constant 0 : index
    %79 = vector.load %arg3[%c1_27, %c0_28, %c0_29] : memref<4x4x512xf32, #tpu.memory_space<vmem>>, vector<1x4x512xf32>
    %80 = vector.shape_cast %79 : vector<1x4x512xf32> to vector<4x512xf32>
    %81 = vector.shape_cast %78 : vector<4x512xf32> to vector<1x4x512xf32>
    tpu.vector_store %arg3[%c1_27, %c0_28, %c0_29], %81 {strides = array<i32>} : memref<4x4x512xf32, #tpu.memory_space<vmem>>, vector<1x4x512xf32>,
    %82 = arith.addf %53, %51 : vector<4x512xf32>
    %83 = arith.addf %82, %63 : vector<4x512xf32>
    %84 = arith.addf %83, %62 : vector<4x512xf32>
    %cst_30 = arith.constant 2.500000e-01 : f32
    %85 = vector.broadcast %cst_30 : f32 to vector<4x512xf32>
    %86 = arith.mulf %84, %85 : vector<4x512xf32>
    %c2 = arith.constant 2 : index
    %c0_31 = arith.constant 0 : index
    %c0_32 = arith.constant 0 : index
    %87 = vector.load %arg3[%c2, %c0_31, %c0_32] : memref<4x4x512xf32, #tpu.memory_space<vmem>>, vector<1x4x512xf32>
    %88 = vector.shape_cast %87 : vector<1x4x512xf32> to vector<4x512xf32>
    %89 = vector.shape_cast %86 : vector<4x512xf32> to vector<1x4x512xf32>
    tpu.vector_store %arg3[%c2, %c0_31, %c0_32], %89 {strides = array<i32>} : memref<4x4x512xf32, #tpu.memory_space<vmem>>, vector<1x4x512xf32>,
    %90 = arith.addf %54, %52 : vector<4x512xf32>
    %91 = arith.addf %90, %53 : vector<4x512xf32>
    %92 = arith.addf %91, %51 : vector<4x512xf32>
    %cst_33 = arith.constant 2.500000e-01 : f32
    %93 = vector.broadcast %cst_33 : f32 to vector<4x512xf32>
    %94 = arith.mulf %92, %93 : vector<4x512xf32>
    %c3 = arith.constant 3 : index
    %c0_34 = arith.constant 0 : index
    %c0_35 = arith.constant 0 : index
    %95 = vector.load %arg3[%c3, %c0_34, %c0_35] : memref<4x4x512xf32, #tpu.memory_space<vmem>>, vector<1x4x512xf32>
    %96 = vector.shape_cast %95 : vector<1x4x512xf32> to vector<4x512xf32>
    %97 = vector.shape_cast %94 : vector<4x512xf32> to vector<1x4x512xf32>
    tpu.vector_store %arg3[%c3, %c0_34, %c0_35], %97 {strides = array<i32>} : memref<4x4x512xf32, #tpu.memory_space<vmem>>, vector<1x4x512xf32>,
    return
  }
}

</mosaic_0001>

<bundles_post_ra>
// kernel: pixel_shuffle_icnr_forward.1
= control target key start
LH: loop header
LB: loop body
LE: loop exit
PB: predicated region body
PF: predicated region fallthrough
CT: control target
= control target key end

     0   :  { %v599_v3 = vmov 0.0   ;;  %vm33_vm0 = vcmask 64512   ;;  %v600_v8 = vmov 0   ;;  %v202_v62 = vlaneseq  ;;  %s905_s0 = inlined_call_operand.vmem [shape: f32[2,8,256], index: 0, kind: input, shape index: {}]   ;;  %s906_s1 = inlined_call_operand.vmem [shape: f32[16,8], index: 1, kind: input, shape index: {}]   ;;  %s907_s2 = inlined_call_operand.vmem [shape: f32[16,1], index: 2, kind: input, shape index: {}]   ;;  %s908_s3 = inlined_call_operand.vmem [shape: f32[4,4,512], index: 3, kind: output, shape index: {}]  }
   0x1   :  { %v15_v0 = vld [vmem:[%s905_s0 + $0x8] sm:$0xff]  ;;  %v581_v1 = vld [vmem:[%s905_s0 + $0x18] sm:$0xff]  ;;  %v14_v2 = vld [vmem:[%s905_s0] sm:$0xff]  ;;  %104 = vmatprep.mubr.f32.mxu0 %v599_v3  ;;  %181 = vmatprep.mubr.f32.mxu1 %v599_v3 }
   0x2   :  { %70 = vmatprep.subr.mxu0 %v15_v0  ;;  %147 = vmatprep.subr.mxu1 %v581_v1  ;;  %v580_v4 = vld [vmem:[%s905_s0 + $0x10] sm:$0xff]  ;;  %v19_v5 = vld [vmem:[%s906_s1] sm:$0xff]  ;;  %v22_v6 = vld [vmem:[%s907_s2 + $0x8] sm:$0xff]  ;;  %v719_v63 = vand.u32 127, %v202_v62 }
   0x3   :  { %71 = vmatpush1.msra.mxu0 %v14_v2  ;;  %148 = vmatpush1.msra.mxu1 %v580_v4  ;;  %v20_v7 = vld [vmem:[%s906_s1 + $0x8] sm:$0xff]  ;;  %v21_v9 = vld [vmem:[%s907_s2] sm:$0xff]  ;;  %s601_s1 = smov 16   ;;  %s602_s2 = smov 1  }
   0x4   :  { %582 = vmatmul.mubr.msk.f32.vlgmr.msra.gmra.mxu0 %vm33_vm0, %v19_v5  ;;  %584 = vmatmul.mubr.msk.f32.vlgmr.msra.gmra.mxu1 %vm33_vm0, %v19_v5  ;;  %v205_v0 = vadd.s32 256, %v719_v63  ;;  %vm319_vm1 = vcmp.lt.s32.totalorder %v719_v63, 16  ;;  %v211_v5 = vand.u32 255, %v719_v63  ;;  %vm340_vm4 = vcmp.lt.s32.totalorder %v719_v63, 1 }
   0x5   :  { %110 = vmatprep.mubr.f32.mxu0 %v599_v3  ;;  %187 = vmatprep.mubr.f32.mxu1 %v599_v3  ;;  %v204_v62 = vadd.s32 128, %v719_v63 }
   0x6   :  { %598 = vset.pattern.permute.xlu0 %v600_v8  ;;  %v225_v1 = vand.u32 255, %v205_v0  ;;  %vm748_vm3 = vcmp.lt.s32.totalorder %v211_v5, 16 }
   0x7   :  { %30 = vperm.xlu0 %598, %v22_v6   ;;  %v270_v5 = vand.u32 15, %v204_v62 }
   0x8   :  { %583 = vmatmul.mubr.msk.f32.gmra.mxu0 %vm33_vm0, %v20_v7  ;;  %585 = vmatmul.mubr.msk.f32.gmra.mxu1 %vm33_vm0, %v20_v7  ;;  %vm723_vm2 = vcmp.lt.s32.totalorder %v225_v1, 16 }
   0x9   :  { %vm820_vm6 = vcmp.eq.s32.totalorder %v270_v5, 0 }
   0xb   :  { %25 = vperm.xlu0 %598, %v21_v9  }
  0x82   :  { %v31_v10 = vpop.permute.xlu0 %30 }
  0x86   :  { %v26_v11 = vpop.permute.xlu0 %25 }
  0xc4   :  { %v106_v12 = vpop.f32.mrf.mxu0  ;;  %v183_v13 = vpop.f32.mrf.mxu1 }
  0xc5   :  { %v184_v14 = vadd.f32 %v183_v13, %v26_v11  ;;  %v107_v17 = vadd.f32 %v106_v12, %v26_v11 }
  0xc6   :  { %v108_v15 = vpop.f32.mrf.mxu0  ;;  %v185_v16 = vpop.f32.mrf.mxu1 }
  0xc7   :  { %v109_v18 = vadd.f32 %v108_v15, %v26_v11  ;;  %v186_v19 = vadd.f32 %v185_v16, %v26_v11  ;;  %v651_v22 = vmax.f32 %v184_v14, 0.0  ;;  %v657_v31 = vmax.f32 %v107_v17, 0.0 }
  0xc8   :  { %v112_v20 = vpop.f32.mrf.mxu0  ;;  %v189_v21 = vpop.f32.mrf.mxu1  ;;  %v277_v17 = vand.u32 15, %v205_v0 }
  0xc9   :  { %v113_v23 = vadd.f32 %v112_v20, %v31_v10  ;;  %v190_v24 = vadd.f32 %v189_v21, %v31_v10  ;;  %v659_v32 = vmax.f32 %v109_v18, 0.0  ;;  %v661_v33 = vmax.f32 %v186_v19, 0.0 }
  0xca   :  { %v114_v25 = vpop.f32.mrf.mxu0  ;;  %v191_v26 = vpop.f32.mrf.mxu1  ;;  %v473_v44 = vrot.slane %v651_v22, 4  ;;  %v471_v45 = vrot.slane %v657_v31, 4  ;;  %vm778_vm5 = vcmp.eq.s32.totalorder %v277_v17, 0 }
  0xcb   :  { %v653_v27 = vmax.f32 %v113_v23, 0.0  ;;  %v655_v28 = vmax.f32 %v190_v24, 0.0  ;;  %v115_v29 = vadd.f32 %v114_v25, %v31_v10  ;;  %v192_v30 = vadd.f32 %v191_v26, %v31_v10 }
  0xcc   :  { %v472_v48 = vrot.slane %v659_v32, 4  ;;  %v474_v50 = vrot.slane %v661_v33, 4 }
  0xcd   :  { %v663_v34 = vmax.f32 %v115_v29, 0.0  ;;  %v665_v35 = vmax.f32 %v192_v30, 0.0  ;;  %315 = vrot.lane.b32.xlu0 %v655_v28, %s601_s1  ;;  %311 = vrot.lane.b32.xlu1 %v653_v27, %s601_s1  ;;  %v671_v36 = vadd.f32 %v655_v28, %v651_v22  ;;  %v547_v37 = vrot.slane %v655_v28, 4 }
  0xce   :  { %v676_v38 = vadd.f32 %v653_v27, %v657_v31  ;;  %v545_v39 = vrot.slane %v653_v27, 4 }
  0xcf   :  { %v681_v40 = vadd.f32 %v663_v34, %v659_v32  ;;  %v546_v41 = vrot.slane %v663_v34, 4  ;;  %v686_v42 = vadd.f32 %v665_v35, %v661_v33  ;;  %v548_v43 = vrot.slane %v665_v35, 4 }
  0xd0   :  { %v555_v46 = vadd.f32 %v547_v37, %v671_v36  ;;  %v553_v47 = vadd.f32 %v545_v39, %v676_v38 }
  0xd1   :  { %313 = vrot.lane.b32.xlu1 %v663_v34, %s601_s1  ;;  %324 = vrot.lane.b32.xlu0 %v657_v31, %s602_s2  ;;  %v554_v49 = vadd.f32 %v546_v41, %v681_v40  ;;  %v556_v51 = vadd.f32 %v548_v43, %v686_v42 }
  0xd2   :  { %v559_v52 = vadd.f32 %v555_v46, %v473_v44  ;;  %v557_v53 = vadd.f32 %v553_v47, %v471_v45 }
  0xd3   :  { %v558_v54 = vadd.f32 %v554_v49, %v472_v48  ;;  %v560_v55 = vadd.f32 %v556_v51, %v474_v50 }
  0xd4   :  { %v563_v58 = vmul.f32 0.25, %v559_v52  ;;  %v561_v59 = vmul.f32 0.25, %v557_v53 }
  0xd5   :  { %317 = vrot.lane.b32.xlu1 %v665_v35, %s601_s1  ;;  %328 = vrot.lane.b32.xlu0 %v659_v32, %s602_s2  ;;  %v562_v56 = vmul.f32 0.25, %v558_v54  ;;  %v564_v57 = vmul.f32 0.25, %v560_v55 }
  0xd7   :  { %v570_v60 = vcombine.high %v563_v58, %v564_v57  ;;  %v569_v61 = vcombine.high %v561_v59, %v562_v56 }
  0xd9   :  { %326 = vrot.lane.b32.xlu1 %v653_v27, %s602_s2  ;;  %332 = vrot.lane.b32.xlu0 %v651_v22, %s602_s2  ;;  %593 = vst [vmem:[%s908_s3 + $0x38] sm:$0xff] %v570_v60  ;;  %592 = vst [vmem:[%s908_s3 + $0x30] sm:$0xff] %v569_v61 }
  0xdd   :  { %334 = vrot.lane.b32.xlu1 %v655_v28, %s602_s2 }
  0xe1   :  { %330 = vrot.lane.b32.xlu1 %v663_v34, %s602_s2 }
 0x13f   :  { %v316_v2 = vpop.permute.xlu0 %315  ;;  %v312_v3 = vpop.permute.xlu1 %311 }
 0x143   :  { %v314_v6 = vpop.permute.xlu1 %313  ;;  %v728_v7 = vpop.permute.xlu0 %324 }
 0x144   :  { %v321_v8 = vsel %vm319_vm1, %v314_v6, %v316_v2  ;;  %v734_v9 = vsel %vm319_vm1, %v312_v3, %v314_v6 }
 0x145   :  { %v739_v10 = vsel %vm723_vm2, %v651_v22, %v321_v8  ;;  %v743_v11 = vadd.f32 %v734_v9, %v659_v32  ;;  %v354_v12 = vrot.slane %v734_v9, 4  ;;  %v355_v49 = vrot.slane %v321_v8, 4 }
 0x146   :  { %v443_v13 = vadd.f32 %v739_v10, %v651_v22  ;;  %v489_v23 = vrot.slane %v739_v10, 4 }
 0x147   :  { %363 = vrot.lane.b32.xlu1 %v354_v12, %s602_s2  ;;  %v318_v15 = vpop.permute.xlu1 %317  ;;  %v329_v16 = vpop.permute.xlu0 %328  ;;  %v480_v18 = vadd.f32 %v472_v48, %v743_v11 }
 0x148   :  { %v481_v19 = vadd.f32 %v473_v44, %v443_v13  ;;  %v756_v20 = vsel %vm319_vm1, %v316_v2, %v318_v15  ;;  %v323_v21 = vsel %vm319_vm1, %v318_v15, %v312_v3  ;;  %v345_v2 = vsel %vm340_vm4, %v728_v7, %v329_v16 }
 0x149   :  { %v353_v24 = vrot.slane %v323_v21, 4  ;;  %v764_v25 = vsel %vm748_vm3, %v657_v31, %v323_v21  ;;  %v768_v26 = vadd.f32 %v756_v20, %v661_v33  ;;  %v356_v39 = vrot.slane %v756_v20, 4 }
 0x14a   :  { %v772_v29 = vadd.f32 %v764_v25, %v657_v31  ;;  %v497_v30 = vadd.f32 %v489_v23, %v481_v19  ;;  %v496_v44 = vadd.f32 %v480_v18, %v354_v12  ;;  %v487_v47 = vrot.slane %v764_v25, 4 }
 0x14b   :  { %v482_v37 = vadd.f32 %v474_v50, %v768_v26  ;;  %361 = vrot.lane.b32.xlu0 %v353_v24, %s602_s2  ;;  %v782_v43 = vpop.permute.xlu0 %332  ;;  %367 = vrot.lane.b32.xlu1 %v356_v39, %s602_s2  ;;  %v382_v12 = vrot.slane %v345_v2, 4 }
 0x14c   :  { %v479_v46 = vadd.f32 %v471_v45, %v772_v29  ;;  %v343_v48 = vsel %vm340_vm4, %v329_v16, %v782_v43  ;;  %v501_v53 = vmul.f32 0.25, %v497_v30  ;;  %v500_v45 = vmul.f32 0.25, %v496_v44 }
 0x14d   :  { %v498_v50 = vadd.f32 %v482_v37, %v356_v39  ;;  %v383_v51 = vrot.slane %v343_v48, 4  ;;  %v390_v24 = vsel %vm820_vm6, %v659_v32, %v382_v12 }
 0x14e   :  { %v495_v52 = vadd.f32 %v487_v47, %v479_v46  ;;  %v446_v44 = vadd.f32 %v743_v11, %v390_v24 }
 0x14f   :  { %v502_v54 = vmul.f32 0.25, %v498_v50  ;;  %v391_v55 = vsel %vm778_vm5, %v651_v22, %v383_v51  ;;  %365 = vrot.lane.b32.xlu0 %v355_v49, %s602_s2  ;;  %338 = vrot.lane.b32.xlu1 %v665_v35, %s602_s2  ;;  %v327_v22 = vpop.permute.xlu1 %326 }
 0x150   :  { %v499_v56 = vmul.f32 0.25, %v495_v52  ;;  %v796_v57 = vadd.f32 %v443_v13, %v391_v55  ;;  %v206_v13 = vadd.s32 384, %v719_v63 }
 0x151   :  { %v508_v58 = vcombine.high %v501_v53, %v502_v54 }
 0x152   :  { %v507_v59 = vcombine.high %v499_v56, %v500_v45  ;;  %v284_v30 = vand.u32 15, %v206_v13 }
 0x153   :  { %589 = vst [vmem:[%s908_s3 + $0x18] sm:$0xff] %v508_v58  ;;  %336 = vrot.lane.b32.xlu0 %v661_v33, %s602_s2  ;;  %v335_v60 = vpop.permute.xlu1 %334 }
 0x154   :  { %588 = vst [vmem:[%s908_s3 + $0x10] sm:$0xff] %v507_v59  ;;  %vm847_vm8 = vcmp.eq.s32.totalorder %v284_v30, 0 }
 0x157   :  { %v331_v61 = vpop.permute.xlu1 %330 }
 0x158   :  { %v344_v0 = vsel %vm340_vm4, %v331_v61, %v335_v60  ;;  %v346_v1 = vsel %vm340_vm4, %v327_v22, %v331_v61 }
 0x159   :  { %v399_v3 = vrot.slane %v344_v0, 4  ;;  %v398_v6 = vrot.slane %v346_v1, 4 }
 0x15b   :  { %v407_v15 = vsel %vm778_vm5, %v655_v28, %v399_v3  ;;  %v406_v18 = vsel %vm820_vm6, %v663_v34, %v398_v6  ;;  %v263_v28 = vand.u32 15, %v719_v63 }
 0x15c   :  { %v520_v21 = vadd.f32 %v671_v36, %v407_v15  ;;  %v519_v37 = vadd.f32 %v681_v40, %v406_v18 }
 0x15d   :  { %vm843_vm7 = vcmp.eq.s32.totalorder %v263_v28, 0 }
 0x15e   :  { %v524_v47 = vadd.f32 %v520_v21, %v391_v55  ;;  %v523_v50 = vadd.f32 %v519_v37, %v390_v24 }
 0x160   :  { %v528_v3 = vmul.f32 0.25, %v524_v47  ;;  %v527_v14 = vmul.f32 0.25, %v523_v50 }
 0x1b9   :  { %v364_v8 = vpop.permute.xlu1 %363 }
 0x1bd   :  { %v362_v16 = vpop.permute.xlu0 %361  ;;  %v368_v23 = vpop.permute.xlu1 %367 }
 0x1be   :  { %v371_v19 = vsel %vm340_vm4, %v362_v16, %v364_v8  ;;  %v372_v36 = vsel %vm340_vm4, %v368_v23, %v362_v16 }
 0x1bf   :  { %v438_v34 = vsel %vm820_vm6, %v734_v9, %v371_v19  ;;  %v413_v53 = vrot.slane %v372_v36, 4 }
 0x1c0   :  { %v450_v51 = vadd.f32 %v446_v44, %v438_v34 }
 0x1c1   :  { %v366_v39 = vpop.permute.xlu0 %365  ;;  %v339_v49 = vpop.permute.xlu1 %338 }
 0x1c2   :  { %v370_v46 = vsel %vm340_vm4, %v364_v8, %v366_v39  ;;  %v342_v11 = vsel %vm340_vm4, %v335_v60, %v339_v49  ;;  %v348_v52 = vsel %vm340_vm4, %v339_v49, %v327_v22  ;;  %v369_v58 = vsel %vm340_vm4, %v366_v39, %v368_v23 }
 0x1c3   :  { %v415_v9 = vrot.slane %v370_v46, 4  ;;  %v397_v54 = vrot.slane %v348_v52, 4  ;;  %v400_v55 = vrot.slane %v342_v11, 4  ;;  %v454_v12 = vmul.f32 0.25, %v450_v51 }
 0x1c5   :  { %v423_v45 = vsel %vm723_vm2, %v343_v48, %v415_v9  ;;  %v337_v56 = vpop.permute.xlu0 %336  ;;  %v405_v22 = vsel %vm843_vm7, %v653_v27, %v397_v54  ;;  %v408_v4 = vsel %vm847_vm8, %v665_v35, %v400_v55 }
 0x1c6   :  { %v431_v59 = vrot.slane %v423_v45, 4  ;;  %v341_v61 = vsel %vm340_vm4, %v782_v43, %v337_v56  ;;  %v347_v60 = vsel %vm340_vm4, %v337_v56, %v728_v7  ;;  %v518_v0 = vadd.f32 %v676_v38, %v405_v22 }
 0x1c7   :  { %v381_v48 = vrot.slane %v347_v60, 4  ;;  %v384_v62 = vrot.slane %v341_v61, 4  ;;  %v521_v1 = vadd.f32 %v686_v42, %v408_v4  ;;  %v421_v63 = vsel %vm748_vm3, %v347_v60, %v413_v53 }
 0x1c8   :  { %v439_v43 = vsel %vm778_vm5, %v739_v10, %v431_v59  ;;  %v429_v38 = vrot.slane %v421_v63, 4 }
 0x1c9   :  { %v451_v7 = vadd.f32 %v796_v57, %v439_v43  ;;  %v389_v27 = vsel %vm843_vm7, %v657_v31, %v381_v48  ;;  %v392_v35 = vsel %vm847_vm8, %v661_v33, %v384_v62  ;;  %v440_v57 = vsel %vm847_vm8, %v756_v20, %v369_v58 }
 0x1ca   :  { %v445_v2 = vadd.f32 %v772_v29, %v389_v27  ;;  %v448_v10 = vadd.f32 %v768_v26, %v392_v35  ;;  %v522_v41 = vadd.f32 %v518_v0, %v389_v27  ;;  %v525_v42 = vadd.f32 %v521_v1, %v392_v35 }
 0x1cb   :  { %v437_v31 = vsel %vm843_vm7, %v764_v25, %v429_v38  ;;  %v455_v29 = vmul.f32 0.25, %v451_v7 }
 0x1cc   :  { %v449_v5 = vadd.f32 %v445_v2, %v437_v31  ;;  %v452_v6 = vadd.f32 %v448_v10, %v440_v57  ;;  %v526_v33 = vmul.f32 0.25, %v522_v41  ;;  %v529_v8 = vmul.f32 0.25, %v525_v42 }
 0x1ce   :  { %v453_v13 = vmul.f32 0.25, %v449_v5  ;;  %v456_v26 = vmul.f32 0.25, %v452_v6  ;;  %v534_v15 = vcombine.low %v526_v33, %v527_v14  ;;  %v535_v17 = vcombine.low %v528_v3, %v529_v8 }
 0x1d0   :  { %v461_v18 = vcombine.low %v453_v13, %v454_v12  ;;  %v462_v16 = vcombine.low %v455_v29, %v456_v26  ;;  %590 = vst [vmem:[%s908_s3 + $0x20] sm:$0xff] %v534_v15  ;;  %591 = vst [vmem:[%s908_s3 + $0x28] sm:$0xff] %v535_v17 }
 0x1d2   :  { %465 = vst [vmem:[%s908_s3] sm:$0xff] %v461_v18  ;;  %466 = vst [vmem:[%s908_s3 + $0x8] sm:$0xff] %v462_v16 }

</bundles_post_ra>
